<compile_context>
chip_gen: v6e
topology: v6e:2x2x1
jax: 0.10.0
libtpu: 0.0.40
codegen_flags: <defaults>
</compile_context>

<pallas_src>
import functools
import math

import jax
import jax.numpy as jnp
from jax import lax
from jax.experimental import pallas as pl
from jax.experimental.pallas import tpu as pltpu

# Contract the last (feature) dim of x with the "in" dim (dim 1) of a PyTorch
# nn.Linear weight W[out, in]  ->  y = x @ W.T, with no explicit transpose.
_CONTRACT_LAST = (((1,), (1,)), ((), ()))

_MIB = 1024 * 1024


def _round_up(x, m):
    return (x + m - 1) // m * m


# --------------------------------------------------------------------------- #
# Kernel 1: K / V projections (hoisted out of the attention kernel).
# --------------------------------------------------------------------------- #
def _kv_proj_kernel(k_ref, v_ref, wk_ref, bk_ref, wv_ref, bv_ref,
                    kp_ref, vp_ref, *, mxu_dtype):
    k = k_ref[0].astype(mxu_dtype)                                    # [TK, D]
    v = v_ref[0].astype(mxu_dtype)                                    # [TK, D]
    kp = lax.dot_general(k, wk_ref[...], _CONTRACT_LAST,
                         preferred_element_type=jnp.float32) + bk_ref[...]
    vp = lax.dot_general(v, wv_ref[...], _CONTRACT_LAST,
                         preferred_element_type=jnp.float32) + bv_ref[...]
    kp_ref[0] = kp.astype(kp_ref.dtype)                               # [TK, Dp]
    vp_ref[0] = vp.astype(vp_ref.dtype)


# --------------------------------------------------------------------------- #
# Kernel 2: fused Q projection + flash-style attention over kv tiles.
# grid = (B, NQ, NK); kv axis innermost & "arbitrary"; b, q axes "parallel".
# --------------------------------------------------------------------------- #
def _attn_kernel(q_ref, kp_ref, vp_ref, wq_ref, bq_ref, o_ref,
                 q_scr, m_scr, l_scr, acc_scr,
                 *, scale, mxu_dtype, tk, sk, mask_k):
    approx = jnp.dtype(mxu_dtype) == jnp.dtype(jnp.bfloat16)
    ki = pl.program_id(2)

    # Q projection + accumulator init, once per (batch, q-tile).
    @pl.when(ki == 0)
    def _():
        q = q_ref[0].astype(mxu_dtype)                                # [TQ, D]
        qp = lax.dot_general(q, wq_ref[...], _CONTRACT_LAST,
                             preferred_element_type=jnp.float32) + bq_ref[...]
        # Fold 1/sqrt(D) into Q ([TQ, Dp]) rather than into scores ([TQ, Sk]).
        q_scr[...] = (qp * scale).astype(q_scr.dtype)
        m_scr[...] = jnp.full_like(m_scr, -jnp.inf)
        l_scr[...] = jnp.zeros_like(l_scr)
        acc_scr[...] = jnp.zeros_like(acc_scr)

    # scores = Q @ K_tile.T, contracting the shared (padded) feature dim.
    s = lax.dot_general(q_scr[...], kp_ref[0], _CONTRACT_LAST,
                        preferred_element_type=jnp.float32)           # [TQ, TK]
    if mask_k:  # static: only emitted when Sk was padded to the kv tile
        col = ki * tk + lax.broadcasted_iota(jnp.int32, s.shape, 1)
        s = jnp.where(col < sk, s, -1e30)

    # Online (flash) softmax update — elementwise math stays f32.
    m_new = jnp.maximum(m_scr[...], jnp.max(s, axis=-1, keepdims=True))
    alpha = jnp.exp(m_scr[...] - m_new)
    p = jnp.exp(s - m_new)
    l_scr[...] = alpha * l_scr[...] + jnp.sum(p, axis=-1, keepdims=True)
    acc_scr[...] = alpha * acc_scr[...] + jnp.dot(
        p.astype(mxu_dtype), vp_ref[0], preferred_element_type=jnp.float32)
    m_scr[...] = m_new

    @pl.when(ki == pl.num_programs(2) - 1)
    def _():
        o_ref[0] = (acc_scr[...] * pl.reciprocal(l_scr[...], approx=approx)
                    ).astype(o_ref.dtype)


# --------------------------------------------------------------------------- #
# VMEM budgeting helpers.
# --------------------------------------------------------------------------- #
def _vmem_cap_bytes():
    phys = 128 * _MIB
    try:
        phys = int(getattr(pltpu.get_tpu_info(), "vmem_capacity_bytes", phys))
    except Exception:
        pass
    if phys <= 64 * _MIB:       # v7x-class part: leave headroom for compiler scratch
        return 48 * _MIB
    return 100 * _MIB           # v5e / v6e: 128 MiB physical -> allow large tiles


def _attn_bytes(tq, tk, d, dp, in_b, mxu_b, out_b):
    return (2 * tq * d * in_b               # query tile, double-buffered
            + 2 * 2 * tk * dp * mxu_b       # projected K & V tiles, double-buffered
            + dp * d * mxu_b + dp * 4       # Wq / bq, single-buffered (constant)
            + 2 * tq * dp * out_b           # output tile, double-buffered
            + tq * dp * (mxu_b + 4)         # Q / acc scratch
            + 2 * tq * 4)                   # m / l scratch


def _proj_bytes(tk, d, dp, in_b, mxu_b):
    return (2 * 2 * tk * d * in_b           # raw K & V tiles, double-buffered
            + 2 * (dp * d * mxu_b + dp * 4) # Wk/bk, Wv/bv, single-buffered
            + 2 * 2 * tk * dp * mxu_b)      # projected K & V output tiles


# --------------------------------------------------------------------------- #
# Wrapper.
# --------------------------------------------------------------------------- #
def encoder_decoder_attention(query, key, value, params, *, mxu_dtype=jnp.bfloat16):
    """query: [B, Sq, D]; key, value: [B, Sk, D]; returns [B, Sq, D].

    mxu_dtype: operand dtype for MXU contractions (accumulation is always f32).
    bfloat16 (default) roughly doubles MXU throughput and halves weight /
    projected-K/V bytes on v6e/v7x; pass jnp.float32 for a numerically tight
    match against the PyTorch reference (recommended on v5e too if exactness
    matters more than speed).
    """
    B, Sq, D = query.shape
    _, Sk, _ = key.shape
    out_dtype = query.dtype
    scale = 1.0 / math.sqrt(D)              # matches torch: / Q.size(-1) ** 0.5

    in_b = jnp.dtype(query.dtype).itemsize
    mxu_b = jnp.dtype(mxu_dtype).itemsize
    out_b = jnp.dtype(out_dtype).itemsize

    # Lane-dense projected feature dim.  Activations stay un-padded; only the
    # weights' "out" dim / biases are padded (padded rows are exactly zero).
    Dp = 128 if D <= 128 else _round_up(D, 256)

    cap = _vmem_cap_bytes()
    small_vmem = cap <= 48 * _MIB           # v7x-class
    TQ = min(256 if small_vmem else 512, _round_up(Sq, 8))
    TK = min(512, _round_up(Sk, 8))

    # Shrink tiles until the (conservative) VMEM footprint fits the budget.
    budget = int(cap * 0.8)
    while (max(_attn_bytes(TQ, TK, D, Dp, in_b, mxu_b, out_b),
               _proj_bytes(TK, D, Dp, in_b, mxu_b)) > budget
           and (TQ > 8 or TK > 8)):
        if TK > 8 and TK >= TQ:
            TK = max(8, _round_up(TK // 2, 8))
        else:
            TQ = max(8, _round_up(TQ // 2, 8))

    Sq_p, Sk_p = _round_up(Sq, TQ), _round_up(Sk, TK)
    NQ, NK = Sq_p // TQ, Sk_p // TK

    need = max(_attn_bytes(TQ, TK, D, Dp, in_b, mxu_b, out_b),
               _proj_bytes(TK, D, Dp, in_b, mxu_b))
    vmem_limit = int(min(cap, max(32 * _MIB, 2 * need)))

    # Pad only the sequence dims (tail tile).  Padded key rows are masked in
    # the attention kernel; padded query rows are sliced away at the end.
    if Sq_p != Sq:
        query = jnp.pad(query, ((0, 0), (0, Sq_p - Sq), (0, 0)))
    if Sk_p != Sk:
        key = jnp.pad(key, ((0, 0), (0, Sk_p - Sk), (0, 0)))
        value = jnp.pad(value, ((0, 0), (0, Sk_p - Sk), (0, 0)))

    pad_out = Dp - D

    def pad_w(w):                           # [D, D] -> [Dp, D], cast once
        return jnp.pad(w, ((0, pad_out), (0, 0))).astype(mxu_dtype)

    def pad_b(b):                           # [D] -> [1, Dp], kept f32
        return jnp.pad(b, (0, pad_out)).reshape(1, Dp).astype(jnp.float32)

    wq, wk, wv = pad_w(params["wq"]), pad_w(params["wk"]), pad_w(params["wv"])
    bq, bk, bv = pad_b(params["bq"]), pad_b(params["bk"]), pad_b(params["bv"])

    buf1 = pl.Buffered(1)                   # constant-index blocks: single buffer

    # ---- pass 1: project K and V once (stored in mxu_dtype) ----------------
    k_proj, v_proj = pl.pallas_call(
        functools.partial(_kv_proj_kernel, mxu_dtype=mxu_dtype),
        out_shape=(jax.ShapeDtypeStruct((B, Sk_p, Dp), mxu_dtype),
                   jax.ShapeDtypeStruct((B, Sk_p, Dp), mxu_dtype)),
        grid_spec=pltpu.PrefetchScalarGridSpec(
            num_scalar_prefetch=0,
            grid=(B, NK),
            in_specs=[
                pl.BlockSpec((1, TK, D), lambda b, k: (b, k, 0)),
                pl.BlockSpec((1, TK, D), lambda b, k: (b, k, 0)),
                pl.BlockSpec((Dp, D), lambda b, k: (0, 0), pipeline_mode=buf1),
                pl.BlockSpec((1, Dp), lambda b, k: (0, 0), pipeline_mode=buf1),
                pl.BlockSpec((Dp, D), lambda b, k: (0, 0), pipeline_mode=buf1),
                pl.BlockSpec((1, Dp), lambda b, k: (0, 0), pipeline_mode=buf1),
            ],
            out_specs=[
                pl.BlockSpec((1, TK, Dp), lambda b, k: (b, k, 0)),
                pl.BlockSpec((1, TK, Dp), lambda b, k: (b, k, 0)),
            ],
        ),
        compiler_params=pltpu.CompilerParams(
            dimension_semantics=("parallel", "parallel"),
            vmem_limit_bytes=vmem_limit,
        ),
    )(key, value, wk, bk, wv, bv)

    # ---- pass 2: fused Q projection + flash attention ----------------------
    kernel = functools.partial(_attn_kernel, scale=scale, mxu_dtype=mxu_dtype,
                               tk=TK, sk=Sk, mask_k=(Sk_p != Sk))

    out = pl.pallas_call(
        kernel,
        out_shape=jax.ShapeDtypeStruct((B, Sq_p, Dp), out_dtype),
        grid_spec=pltpu.PrefetchScalarGridSpec(
            num_scalar_prefetch=0,
            grid=(B, NQ, NK),
            in_specs=[
                pl.BlockSpec((1, TQ, D), lambda b, q, k: (b, q, 0)),
                pl.BlockSpec((1, TK, Dp), lambda b, q, k: (b, k, 0)),
                pl.BlockSpec((1, TK, Dp), lambda b, q, k: (b, k, 0)),
                pl.BlockSpec((Dp, D), lambda b, q, k: (0, 0), pipeline_mode=buf1),
                pl.BlockSpec((1, Dp), lambda b, q, k: (0, 0), pipeline_mode=buf1),
            ],
            out_specs=pl.BlockSpec((1, TQ, Dp), lambda b, q, k: (b, q, 0)),
            scratch_shapes=[
                pltpu.VMEM((TQ, Dp), mxu_dtype),    # projected + scaled Q tile
                pltpu.VMEM((TQ, 1), jnp.float32),   # running max
                pltpu.VMEM((TQ, 1), jnp.float32),   # running denominator
                pltpu.VMEM((TQ, Dp), jnp.float32),  # output accumulator
            ],
        ),
        compiler_params=pltpu.CompilerParams(
            dimension_semantics=("parallel", "parallel", "arbitrary"),
            vmem_limit_bytes=vmem_limit,
        ),
    )(query, k_proj, v_proj, wq, bq)

    return out[:, :Sq, :D]


# --------------------------------------------------------------------------- #
# Params / reference / test.
# --------------------------------------------------------------------------- #
def init_params(rng, d):
    """Deterministic nn.Linear-style init: U(-1/sqrt(d), 1/sqrt(d))."""
    keys = jax.random.split(rng, 6)
    bound = 1.0 / (d ** 0.5)
    u = lambda k, shape: jax.random.uniform(k, shape, jnp.float32, -bound, bound)
    return {
        "wq": u(keys[0], (d, d)), "bq": u(keys[1], (d,)),
        "wk": u(keys[2], (d, d)), "bk": u(keys[3], (d,)),
        "wv": u(keys[4], (d, d)), "bv": u(keys[5], (d,)),
    }


def _reference(query, key, value, p):
    Q = query @ p["wq"].T + p["bq"]
    K = key   @ p["wk"].T + p["bk"]
    V = value @ p["wv"].T + p["bv"]
    scores = jnp.einsum("bqd,bkd->bqk", Q, K) / (Q.shape[-1] ** 0.5)
    w = jax.nn.softmax(scores, axis=-1)
    return jnp.einsum("bqk,bkd->bqd", w, V)


if __name__ == "__main__":
    B, Sq, Sk, D = 2, 8, 8, 32
    root = jax.random.PRNGKey(0)
    kq, kk, kv, kparam = jax.random.split(root, 4)

    query = jax.random.normal(kq, (B, Sq, D), jnp.float32)
    key = jax.random.normal(kk, (B, Sk, D), jnp.float32)
    value = jax.random.normal(kv, (B, Sk, D), jnp.float32)
    params = init_params(kparam, D)

    ref = _reference(query, key, value, params)

    # f32 MXU path: tight-tolerance check against the reference.
    out_f32 = jax.block_until_ready(
        encoder_decoder_attention(query, key, value, params, mxu_dtype=jnp.float32))
    assert out_f32.shape == (B, Sq, D)
    assert jnp.allclose(out_f32, ref, atol=1e-4, rtol=1e-4), "f32 mismatch vs reference"

    # Default bf16 MXU operands + f32 accumulation: fast path, looser tolerance.
    out_bf16 = jax.block_until_ready(
        encoder_decoder_attention(query, key, value, params))
    assert out_bf16.shape == (B, Sq, D)
    assert jnp.allclose(out_bf16, ref, atol=8e-2, rtol=8e-2), "bf16 mismatch vs reference"

    print("KERNEL_OK")
</pallas_src>

<mosaic_0001>
module attributes {stable_mosaic.version = 11 : i64} {
  func.func @_kv_proj_kernel(%arg0: i32, %arg1: i32, %arg2: memref<1x8x32xf32, #tpu.memory_space<vmem>>, %arg3: memref<1x8x32xf32, #tpu.memory_space<vmem>>, %arg4: memref<128x32xf32, #tpu.memory_space<vmem>>, %arg5: memref<1x128xf32, #tpu.memory_space<vmem>>, %arg6: memref<128x32xf32, #tpu.memory_space<vmem>>, %arg7: memref<1x128xf32, #tpu.memory_space<vmem>>, %arg8: memref<1x8x128xf32, #tpu.memory_space<vmem>>, %arg9: memref<1x8x128xf32, #tpu.memory_space<vmem>>) attributes {dimension_semantics = [#tpu.dimension_semantics<parallel>, #tpu.dimension_semantics<parallel>], iteration_bounds = array<i64: 2, 1>, scalar_prefetch = 0 : i64, scratch_operands = 0 : i64, tpu.core_type = #tpu.core_type<tc>, window_params = [{transform_indices = @transform_0, window_bounds = array<i64: 1, 8, 32>}, {transform_indices = @transform_1, window_bounds = array<i64: 1, 8, 32>}, {pipeline_mode = #tpu.pipeline_mode<synchronous>, transform_indices = @transform_2, window_bounds = array<i64: 128, 32>}, {pipeline_mode = #tpu.pipeline_mode<synchronous>, transform_indices = @transform_3, window_bounds = array<i64: 1, 128>}, {pipeline_mode = #tpu.pipeline_mode<synchronous>, transform_indices = @transform_4, window_bounds = array<i64: 128, 32>}, {pipeline_mode = #tpu.pipeline_mode<synchronous>, transform_indices = @transform_5, window_bounds = array<i64: 1, 128>}, {transform_indices = @transform_6, window_bounds = array<i64: 1, 8, 128>}, {transform_indices = @transform_7, window_bounds = array<i64: 1, 8, 128>}]} {
    %c0 = arith.constant 0 : index
    %c0_0 = arith.constant 0 : index
    %c0_1 = arith.constant 0 : index
    %0 = vector.load %arg2[%c0, %c0_0, %c0_1] : memref<1x8x32xf32, #tpu.memory_space<vmem>>, vector<1x8x32xf32>
    %1 = vector.shape_cast %0 : vector<1x8x32xf32> to vector<8x32xf32>
    %c0_2 = arith.constant 0 : index
    %c0_3 = arith.constant 0 : index
    %c0_4 = arith.constant 0 : index
    %2 = vector.load %arg3[%c0_2, %c0_3, %c0_4] : memref<1x8x32xf32, #tpu.memory_space<vmem>>, vector<1x8x32xf32>
    %3 = vector.shape_cast %2 : vector<1x8x32xf32> to vector<8x32xf32>
    %c0_5 = arith.constant 0 : index
    %c0_6 = arith.constant 0 : index
    %4 = vector.load %arg4[%c0_5, %c0_6] : memref<128x32xf32, #tpu.memory_space<vmem>>, vector<128x32xf32>
    %cst = arith.constant dense<0.000000e+00> : vector<8x128xf32>
    %5 = tpu.matmul %1, %4, %cst {dimension_numbers = #tpu.dot_dimension_numbers<[1], [1], [0], [0], [0, 0, 1, 0], [], []>} : vector<8x32xf32>, vector<128x32xf32>, vector<8x128xf32> -> vector<8x128xf32>
    %c0_7 = arith.constant 0 : index
    %c0_8 = arith.constant 0 : index
    %6 = vector.load %arg5[%c0_7, %c0_8] : memref<1x128xf32, #tpu.memory_space<vmem>>, vector<1x128xf32>
    %7 = vector.broadcast %6 : vector<1x128xf32> to vector<8x128xf32>
    %8 = arith.addf %5, %7 : vector<8x128xf32>
    %c0_9 = arith.constant 0 : index
    %c0_10 = arith.constant 0 : index
    %9 = vector.load %arg6[%c0_9, %c0_10] : memref<128x32xf32, #tpu.memory_space<vmem>>, vector<128x32xf32>
    %cst_11 = arith.constant dense<0.000000e+00> : vector<8x128xf32>
    %10 = tpu.matmul %3, %9, %cst_11 {dimension_numbers = #tpu.dot_dimension_numbers<[1], [1], [0], [0], [0, 0, 1, 0], [], []>} : vector<8x32xf32>, vector<128x32xf32>, vector<8x128xf32> -> vector<8x128xf32>
    %c0_12 = arith.constant 0 : index
    %c0_13 = arith.constant 0 : index
    %11 = vector.load %arg7[%c0_12, %c0_13] : memref<1x128xf32, #tpu.memory_space<vmem>>, vector<1x128xf32>
    %12 = vector.broadcast %11 : vector<1x128xf32> to vector<8x128xf32>
    %13 = arith.addf %10, %12 : vector<8x128xf32>
    %c0_14 = arith.constant 0 : index
    %c0_15 = arith.constant 0 : index
    %c0_16 = arith.constant 0 : index
    %14 = vector.load %arg8[%c0_14, %c0_15, %c0_16] : memref<1x8x128xf32, #tpu.memory_space<vmem>>, vector<1x8x128xf32>
    %15 = vector.shape_cast %14 : vector<1x8x128xf32> to vector<8x128xf32>
    %16 = vector.shape_cast %8 : vector<8x128xf32> to vector<1x8x128xf32>
    tpu.vector_store %arg8[%c0_14, %c0_15, %c0_16], %16 {strides = array<i32>} : memref<1x8x128xf32, #tpu.memory_space<vmem>>, vector<1x8x128xf32>,
    %c0_17 = arith.constant 0 : index
    %c0_18 = arith.constant 0 : index
    %c0_19 = arith.constant 0 : index
    %17 = vector.load %arg9[%c0_17, %c0_18, %c0_19] : memref<1x8x128xf32, #tpu.memory_space<vmem>>, vector<1x8x128xf32>
    %18 = vector.shape_cast %17 : vector<1x8x128xf32> to vector<8x128xf32>
    %19 = vector.shape_cast %13 : vector<8x128xf32> to vector<1x8x128xf32>
    tpu.vector_store %arg9[%c0_17, %c0_18, %c0_19], %19 {strides = array<i32>} : memref<1x8x128xf32, #tpu.memory_space<vmem>>, vector<1x8x128xf32>,
    return
  }
  func.func @transform_0(%arg0: i32, %arg1: i32) -> (i32, i32, i32) {
    %c0_i32 = arith.constant 0 : i32
    %c0_i32_0 = arith.constant 0 : i32
    return %arg0, %arg1, %c0_i32 : i32, i32, i32
  }
  func.func @transform_1(%arg0: i32, %arg1: i32) -> (i32, i32, i32) {
    %c0_i32 = arith.constant 0 : i32
    %c0_i32_0 = arith.constant 0 : i32
    return %arg0, %arg1, %c0_i32 : i32, i32, i32
  }
  func.func @transform_2(%arg0: i32, %arg1: i32) -> (i32, i32) {
    %c0_i32 = arith.constant 0 : i32
    %c0_i32_0 = arith.constant 0 : i32
    %c0_i32_1 = arith.constant 0 : i32
    return %c0_i32, %c0_i32_0 : i32, i32
  }
  func.func @transform_3(%arg0: i32, %arg1: i32) -> (i32, i32) {
    %c0_i32 = arith.constant 0 : i32
    %c0_i32_0 = arith.constant 0 : i32
    %c0_i32_1 = arith.constant 0 : i32
    return %c0_i32, %c0_i32_0 : i32, i32
  }
  func.func @transform_4(%arg0: i32, %arg1: i32) -> (i32, i32) {
    %c0_i32 = arith.constant 0 : i32
    %c0_i32_0 = arith.constant 0 : i32
    %c0_i32_1 = arith.constant 0 : i32
    return %c0_i32, %c0_i32_0 : i32, i32
  }
  func.func @transform_5(%arg0: i32, %arg1: i32) -> (i32, i32) {
    %c0_i32 = arith.constant 0 : i32
    %c0_i32_0 = arith.constant 0 : i32
    %c0_i32_1 = arith.constant 0 : i32
    return %c0_i32, %c0_i32_0 : i32, i32
  }
  func.func @transform_6(%arg0: i32, %arg1: i32) -> (i32, i32, i32) {
    %c0_i32 = arith.constant 0 : i32
    %c0_i32_0 = arith.constant 0 : i32
    return %arg0, %arg1, %c0_i32 : i32, i32, i32
  }
  func.func @transform_7(%arg0: i32, %arg1: i32) -> (i32, i32, i32) {
    %c0_i32 = arith.constant 0 : i32
    %c0_i32_0 = arith.constant 0 : i32
    return %arg0, %arg1, %c0_i32 : i32, i32, i32
  }
}

</mosaic_0001>

<bundles_post_ra>
// kernel: tpu_custom_call.1
= control target key start
LH: loop header
LB: loop body
LE: loop exit
PB: predicated region body
PF: predicated region fallthrough
CT: control target
= control target key end

     0   :  { %s1471_s0 = inlined_call_operand.vmem [shape: f32[2,8,32], index: 0, kind: input, shape index: {}]   ;;  %s1472_s1 = inlined_call_operand.vmem [shape: f32[2,8,32], index: 1, kind: input, shape index: {}]   ;;  %s1473_s2 = inlined_call_operand.vmem [shape: f32[128,32], index: 2, kind: input, shape index: {}]   ;;  %s1474_s3 = inlined_call_operand.vmem [shape: f32[1,128], index: 3, kind: input, shape index: {}]   ;;  %s1475_s4 = inlined_call_operand.vmem [shape: f32[128,32], index: 4, kind: input, shape index: {}]   ;;  %s1476_s5 = inlined_call_operand.vmem [shape: f32[1,128], index: 5, kind: input, shape index: {}]   ;;  %s1477_s6 = inlined_call_operand.hbm [shape: f32[2,8,128], index: 6, kind: output, shape index: {0}]   ;;  %s1478_s7 = inlined_call_operand.hbm [shape: f32[2,8,128], index: 7, kind: output, shape index: {1}]  }
   0x1   :  { %1479 = sst [smem:[#allocation8_spill]] %s1471_s0 }
   0x2   :  { %13 = vsyncpa [#allocation3], 0 }
   0x3   :  { %15 = vsyncpa [#allocation3 + $0x1], 0 }
   0x4   :  { %16 = vsyncpa [#allocation5], 0 }
   0x5   :  { %18 = vsyncpa [#allocation5 + $0x1], 0  ;;  %s1155_s24 = smov 0   ;;  %s1157_s25 = smov 0  }
   0x6   :  { %s1159_s26 = smov 0   ;;  %s1161_s27 = smov 0  }
   0x7   :  { %s1163_s28 = smov 0   ;;  %s1165_s29 = smov 0  }
   0x8 LB: > { %s786_s30 = sadd.s32 4294967295, %s1109_s29   ;;  %s787_s8 = sadd.s32 4294967294, %s1109_s29   ;;  %s1109_s29 = sphi %s1165_s29, %s24_s29   ;;  %s1105_s28 = sphi %s1163_s28, %s1487_s28   ;;  %s1101_s27 = sphi %s1161_s27, %s1486_s27   ;;  %s1097_s26 = sphi %s1159_s26, %s1485_s26   ;;  %s1093_s25 = sphi %s1157_s25, %s1484_s25   ;;  %s1089_s24 = sphi %s1155_s24, %s1483_s24  }
   0x9   : > { %s36_s9 = sadd.s32 1, %s1105_s28  ;;  %s185_s10 = sadd.s32 1, %s1097_s26 }
   0xa   : > { %p38_p0 = scmp.ge.s32.totalorder %s36_s9, 2  ;;  %p195_p1 = scmp.ne.s32.totalorder %s1097_s26, %s1093_s25 }
   0xb   : > { %p196_p2 = scmp.eq.s32.totalorder %s786_s30, 1  ;;  %p201_p3 = scmp.ne.s32.totalorder %s1093_s25, %s1089_s24 }
   0xc   : > { %s1489_s9 = smov (%p38_p0, %s36_s9), 0  ;;  %p202_p5 = scmp.eq.s32.totalorder %s787_s8, 1 }
   0xd   : > { %p1195_p4 = por %p196_p2, %p195_p1  ;;  %s180_s12 = ssub.s32 %s1105_s28, %s1489_s9 }
   0xe   : > { %p790_p6 = scmp.ge.s32.totalorder %s1109_s29, 1  ;;  %p183_p7 = scmp.eq.s32.totalorder %s180_s12, 0 }
   0xf   : > { %p1202_p8 = por %p202_p5, %p201_p3  ;;  %p280_p9 = scmp.lt.s32.totalorder %s1109_s29, 3 }
  0x10   : > { %s1208_s14 = scalar_select %p183_p7, %s1097_s26, %s185_s10  }
  0x11   : > { %p281_p10 = pnand %p790_p6, %p280_p9 }
  0x12   : > { %p326_p11 = scmp.lt.s32.totalorder (!%p281_p10), %s1101_s27, 1  ;;  %s1482_s0 = sld [smem:[#allocation8_spill]] (!%p281_p10) }
  0x13   : > { %284 = sbr.rel (%p281_p10) target bundleno = 319 (0x13f), region = 44  ;;  %s1383_s22 = sand.u32 (!%p281_p10), 1, %s1093_s25  }
  0x14   : > { %s791_s23 = sshll.u32 (!%p281_p10), %s1383_s22, 3  ;;  %s833_s8 = sshll.u32 (!%p281_p10), %s1101_s27, 7 }
  0x15   : > { %s318_s16 = scalar_lea.vmem (!%p281_p10), [#allocation2], %s791_s23  ;;  %s1403_s12 = scalar_lea.hbm (!%p281_p10), %s1478_s7, %s833_s8 }
  0x16   : > { %s653_s17 = sshll.u32 (!%p281_p10), %s318_s16, 4  ;;  %s1113_s20 = smov (!%p281_p10), [#allocation2]   ;;  %s1398_s17 = int_to_ptr.vmem [resolvable:$true] %s653_s17 }
  0x17   : > { %s1003_s15 = scalar_lea.vmem (!%p281_p10), %s1398_s17, 128 }
  0x18   : > { %v357_v0 = vld [vmem:[%s1473_s2 + $0x78] sm:$0xff]  ;;  %vm365_vm0 = vcmask 261120   ;;  %v1111_v2 = vmov 0.0   ;;  %v356_v3 = vld [vmem:[%s1473_s2 + $0x70] sm:$0xff]  ;;  %vm1112_vm1 = vmmov 0   ;;  %v355_v5 = vld [vmem:[%s1473_s2 + $0x68] sm:$0xff]  ;;  %p1004_p12 = scmp.ne.s32.totalorder %s1398_s17, %s1003_s15 }
  0x19   : > { %v502_v1 = vld [vmem:[%s1475_s4 + $0x78] sm:$0xff]  ;;  %871 = vmatprep.subr.mxu0 %v1111_v2  ;;  %906 = vmatprep.subr.mxu1 %v1111_v2  ;;  %v501_v4 = vld [vmem:[%s1475_s4 + $0x70] sm:$0xff]  ;;  %v500_v6 = vld [vmem:[%s1475_s4 + $0x68] sm:$0xff]  ;;  %s327_s19 = scalar_select %p326_p11, %s1101_s27, 1 }
  0x1a   : > { %872 = vmatpush3.xpose.msk.msra.mxu0 %vm365_vm0, %v357_v0  ;;  %907 = vmatpush3.xpose.msk.msra.mxu1 %vm365_vm0, %v502_v1  ;;  %v354_v7 = vld [vmem:[%s1473_s2 + $0x60] sm:$0xff]  ;;  %v353_v9 = vld [vmem:[%s1473_s2 + $0x58] sm:$0xff]  ;;  %v352_v11 = vld [vmem:[%s1473_s2 + $0x50] sm:$0xff]  ;;  %s1396_s27 = scalar_lea.hbm %s1477_s6, %s833_s8  ;;  %p1005_p13 = pnand %p1004_p12, %p1195_p4 }
  0x1b   : > { %873 = vmatprep.subr.mxu0 %v1111_v2  ;;  %908 = vmatprep.subr.mxu1 %v1111_v2  ;;  %v499_v8 = vld [vmem:[%s1475_s4 + $0x60] sm:$0xff]  ;;  %v498_v10 = vld [vmem:[%s1475_s4 + $0x58] sm:$0xff]  ;;  %v497_v12 = vld [vmem:[%s1475_s4 + $0x50] sm:$0xff]  ;;  %s793_s30 = sshll.u32 %s327_s19, 3 }
  0x1c   : > { %903 = vmatprep.mubr.msk.f32.mxu0 %vm1112_vm1, %v1111_v2  ;;  %938 = vmatprep.mubr.msk.f32.mxu1 %vm1112_vm1, %v1111_v2  ;;  %v351_v13 = vld [vmem:[%s1473_s2 + $0x48] sm:$0xff]  ;;  %v350_v15 = vld [vmem:[%s1473_s2 + $0x40] sm:$0xff]  ;;  %v349_v17 = vld [vmem:[%s1473_s2 + $0x38] sm:$0xff]  ;;  %s332_s18 = scalar_lea.vmem %s1482_s0, %s793_s30  ;;  %s339_s21 = scalar_lea.vmem %s1472_s1, %s793_s30 }
  0x1d   : > { %v496_v14 = vld [vmem:[%s1475_s4 + $0x48] sm:$0xff]  ;;  %v495_v16 = vld [vmem:[%s1475_s4 + $0x40] sm:$0xff]  ;;  %v494_v18 = vld [vmem:[%s1475_s4 + $0x38] sm:$0xff]  ;;  %s634_s30 = scalar_lea.sflag [#allocation3], %s1383_s22  ;;  %p1006_p0 = pneg %p1005_p13 }
  0x1e   : > { %874 = vmatpush3.xpose.msk.msra.mxu0 %vm365_vm0, %v356_v3  ;;  %909 = vmatpush3.xpose.msk.msra.mxu1 %vm365_vm0, %v501_v4  ;;  %v348_v19 = vld [vmem:[%s1473_s2 + $0x30] sm:$0xff]  ;;  %v347_v21 = vld [vmem:[%s1473_s2 + $0x28] sm:$0xff]  ;;  %v346_v23 = vld [vmem:[%s1473_s2 + $0x20] sm:$0xff] }
  0x1f   : > { %875 = vmatprep.subr.mxu0 %v1111_v2  ;;  %910 = vmatprep.subr.mxu1 %v1111_v2  ;;  %v493_v20 = vld [vmem:[%s1475_s4 + $0x30] sm:$0xff]  ;;  %v492_v22 = vld [vmem:[%s1475_s4 + $0x28] sm:$0xff]  ;;  %v491_v24 = vld [vmem:[%s1475_s4 + $0x20] sm:$0xff] }
  0x20   : > { %v345_v25 = vld [vmem:[%s1473_s2 + $0x18] sm:$0xff]  ;;  %v344_v27 = vld [vmem:[%s1473_s2 + $0x10] sm:$0xff]  ;;  %v343_v29 = vld [vmem:[%s1473_s2 + $0x8] sm:$0xff] }
  0x21   : > { %v490_v26 = vld [vmem:[%s1475_s4 + $0x18] sm:$0xff]  ;;  %v489_v28 = vld [vmem:[%s1475_s4 + $0x10] sm:$0xff]  ;;  %v488_v30 = vld [vmem:[%s1475_s4 + $0x8] sm:$0xff] }
  0x22   : > { %876 = vmatpush3.xpose.msk.msra.mxu0 %vm365_vm0, %v355_v5  ;;  %911 = vmatpush3.xpose.msk.msra.mxu1 %vm365_vm0, %v500_v6  ;;  %v342_v31 = vld [vmem:[%s1473_s2] sm:$0xff] }
  0x23   : > { %877 = vmatprep.subr.mxu0 %v1111_v2  ;;  %912 = vmatprep.subr.mxu1 %v1111_v2  ;;  %v487_v32 = vld [vmem:[%s1475_s4] sm:$0xff] }
  0x24   : > { %v340_v33 = vld [vmem:[%s332_s18] sm:$0xff]  ;;  %s325_s18 = scalar_lea.vmem [#allocation4], %s791_s23 }
  0x25   : > { %v341_v34 = vld [vmem:[%s339_s21] sm:$0xff]  ;;  %s667_s19 = sshll.u32 %s325_s18, 4  ;;  %s1007_s21 = sshll.u32 %s1113_s20, 4  ;;  %s1405_s19 = int_to_ptr.vmem [resolvable:$true] %s667_s19  ;;  %s1008_s21 = int_to_ptr.vmem [resolvable:$false] %s1007_s21 }
  0x26   : > { %878 = vmatpush3.xpose.msk.msra.mxu0 %vm365_vm0, %v354_v7  ;;  %913 = vmatpush3.xpose.msk.msra.mxu1 %vm365_vm0, %v499_v8  ;;  %v795_v35 = vld [vmem:[%s1474_s3] ss:$0 sm:$0xff]  ;;  %s1009_s0 = scalar_lea.vmem %s1008_s21, 256  ;;  %p1010_p1 = scmp.lt.s32.totalorder %s1398_s17, %s1008_s21 }
  0x27   : > { %879 = vmatprep.subr.mxu0 %v1111_v2  ;;  %914 = vmatprep.subr.mxu1 %v1111_v2  ;;  %v813_v36 = vld [vmem:[%s1476_s5] ss:$0 sm:$0xff]  ;;  %p1011_p2 = scmp.lt.s32.totalorder %s1009_s0, %s1003_s15 }
  0x29   : > { %p1012_p3 = por %p1011_p2, %p1010_p1 }
  0x2a   : > { %880 = vmatpush3.xpose.msk.msra.mxu0 %vm365_vm0, %v353_v9  ;;  %915 = vmatpush3.xpose.msk.msra.mxu1 %vm365_vm0, %v498_v10 }
  0x2b   : > { %881 = vmatprep.subr.mxu0 %v1111_v2  ;;  %916 = vmatprep.subr.mxu1 %v1111_v2  ;;  %p1013_p5 = pnand %p1012_p3, %p1006_p0 }
  0x2e   : > { %882 = vmatpush3.xpose.msk.msra.mxu0 %vm365_vm0, %v352_v11  ;;  %917 = vmatpush3.xpose.msk.msra.mxu1 %vm365_vm0, %v497_v12 }
  0x2f   : > { %883 = vmatprep.subr.mxu0 %v1111_v2  ;;  %918 = vmatprep.subr.mxu1 %v1111_v2 }
  0x32   : > { %884 = vmatpush3.xpose.msk.msra.mxu0 %vm365_vm0, %v351_v13  ;;  %919 = vmatpush3.xpose.msk.msra.mxu1 %vm365_vm0, %v496_v14 }
  0x33   : > { %885 = vmatprep.subr.mxu0 %v1111_v2  ;;  %920 = vmatprep.subr.mxu1 %v1111_v2 }
  0x36   : > { %886 = vmatpush3.xpose.msk.msra.mxu0 %vm365_vm0, %v350_v15  ;;  %921 = vmatpush3.xpose.msk.msra.mxu1 %vm365_vm0, %v495_v16 }
  0x37   : > { %887 = vmatprep.subr.mxu0 %v1111_v2  ;;  %922 = vmatprep.subr.mxu1 %v1111_v2 }
  0x3a   : > { %888 = vmatpush3.xpose.msk.msra.mxu0 %vm365_vm0, %v349_v17  ;;  %923 = vmatpush3.xpose.msk.msra.mxu1 %vm365_vm0, %v494_v18 }
  0x3b   : > { %889 = vmatprep.subr.mxu0 %v1111_v2  ;;  %924 = vmatprep.subr.mxu1 %v1111_v2 }
  0x3e   : > { %890 = vmatpush3.xpose.msk.msra.mxu0 %vm365_vm0, %v348_v19  ;;  %925 = vmatpush3.xpose.msk.msra.mxu1 %vm365_vm0, %v493_v20 }
  0x3f   : > { %891 = vmatprep.subr.mxu0 %v1111_v2  ;;  %926 = vmatprep.subr.mxu1 %v1111_v2 }
  0x42   : > { %892 = vmatpush3.xpose.msk.msra.mxu0 %vm365_vm0, %v347_v21  ;;  %927 = vmatpush3.xpose.msk.msra.mxu1 %vm365_vm0, %v492_v22 }
  0x43   : > { %893 = vmatprep.subr.mxu0 %v1111_v2  ;;  %928 = vmatprep.subr.mxu1 %v1111_v2 }
  0x46   : > { %894 = vmatpush3.xpose.msk.msra.mxu0 %vm365_vm0, %v346_v23  ;;  %929 = vmatpush3.xpose.msk.msra.mxu1 %vm365_vm0, %v491_v24 }
  0x47   : > { %895 = vmatprep.subr.mxu0 %v1111_v2  ;;  %930 = vmatprep.subr.mxu1 %v1111_v2 }
  0x4a   : > { %896 = vmatpush3.xpose.msk.msra.mxu0 %vm365_vm0, %v345_v25  ;;  %931 = vmatpush3.xpose.msk.msra.mxu1 %vm365_vm0, %v490_v26 }
  0x4b   : > { %897 = vmatprep.subr.mxu0 %v1111_v2  ;;  %932 = vmatprep.subr.mxu1 %v1111_v2 }
  0x4e   : > { %898 = vmatpush3.xpose.msk.msra.mxu0 %vm365_vm0, %v344_v27  ;;  %933 = vmatpush3.xpose.msk.msra.mxu1 %vm365_vm0, %v489_v28 }
  0x4f   : > { %899 = vmatprep.subr.mxu0 %v1111_v2  ;;  %934 = vmatprep.subr.mxu1 %v1111_v2 }
  0x52   : > { %900 = vmatpush3.xpose.msk.msra.mxu0 %vm365_vm0, %v343_v29  ;;  %935 = vmatpush3.xpose.msk.msra.mxu1 %vm365_vm0, %v488_v30 }
  0x53   : > { %901 = vmatprep.subr.mxu0 %v1111_v2  ;;  %936 = vmatprep.subr.mxu1 %v1111_v2 }
  0x56   : > { %902 = vmatpush3.xpose.msk.msra.mxu0 %vm365_vm0, %v342_v31  ;;  %937 = vmatpush3.xpose.msk.msra.mxu1 %vm365_vm0, %v487_v32 }
  0x59   : > { %904 = vmatmul.mubr.msk.f32.vlgmr.msra.gmra.mxu0 %vm365_vm0, %v340_v33  ;;  %939 = vmatmul.mubr.msk.f32.vlgmr.msra.gmra.mxu1 %vm365_vm0, %v341_v34 }
 0x119   : > { %v483_v37 = vpop.f32.mrf.mxu0  ;;  %v627_v38 = vpop.f32.mrf.mxu1 }
 0x11a   : > { %v484_v39 = vadd.f32 %v795_v35, %v483_v37  ;;  %v628_v40 = vadd.f32 %v813_v36, %v627_v38 }
 0x11b   : > { %v905_v41 = vpop.f32.mrf.mxu0  ;;  %v940_v42 = vpop.f32.mrf.mxu1 }
 0x11c   : > { %631 = vst [vmem:[%s318_s16] sm:$0xff] %v484_v39  ;;  %632 = vst [vmem:[%s325_s18] sm:$0xff] %v628_v40 }
 0x11d   : > { %1016 = shalt.err (!%p1013_p5)
}
 0x11e   : > { %s1017_s8 = scalar_lea.hbm %s1396_s27, 128  ;;  %s1021_s10 = scalar_lea.hbm %s1477_s6, 256 }
 0x11f   : > { %p1018_p6 = scmp.ne.s32.totalorder %s1396_s27, %s1017_s8  ;;  %p1022_p10 = scmp.lt.s32.totalorder %s1396_s27, %s1477_s6 }
 0x120   : > { %p1023_p11 = scmp.lt.s32.totalorder %s1021_s10, %s1017_s8 }
 0x121   : > { %p1019_p7 = pnand %p1018_p6, %p1195_p4 }
 0x122   : > { %p1024_p12 = por %p1023_p11, %p1022_p10 }
 0x123   : > { %p1020_p9 = pneg %p1019_p7 }
 0x125   : > { %p1025_p13 = pnand %p1024_p12, %p1020_p9 }
 0x127   : > { %1028 = shalt.err (!%p1025_p13)
}
 0x128   : > { %941 = dma.vmem_to_hbm [thread:$0]  (%p1195_p4), %s1398_s17, 128, %s1396_s27, %s634_s30  }
 0x129   : > { %s639_s0 = scalar_lea.sflag [#allocation5], %s1383_s22  ;;  %s1029_s15 = scalar_lea.vmem %s1405_s19, 128 }
 0x12a   : > { %p1030_p0 = scmp.ne.s32.totalorder %s1405_s19, %s1029_s15  ;;  %s1114_s21 = smov [#allocation4]  }
 0x12b   : > { %s1033_s8 = sshll.u32 %s1114_s21, 4  ;;  %s1034_s8 = int_to_ptr.vmem [resolvable:$false] %s1033_s8 }
 0x12c   : > { %p1031_p1 = pnand %p1030_p0, %p1195_p4  ;;  %s1035_s16 = scalar_lea.vmem %s1034_s8, 256 }
 0x12d   : > { %p1036_p3 = scmp.lt.s32.totalorder %s1405_s19, %s1034_s8  ;;  %p1037_p5 = scmp.lt.s32.totalorder %s1035_s16, %s1029_s15 }
 0x12e   : > { %p1032_p2 = pneg %p1031_p1 }
 0x12f   : > { %p1038_p6 = por %p1037_p5, %p1036_p3 }
 0x131   : > { %p1039_p7 = pnand %p1038_p6, %p1032_p2 }
 0x133   : > { %1042 = shalt.err (!%p1039_p7)
}
 0x134   : > { %s1043_s17 = scalar_lea.hbm %s1403_s12, 128  ;;  %s1047_s30 = scalar_lea.hbm %s1478_s7, 256 }
 0x135   : > { %p1044_p9 = scmp.ne.s32.totalorder %s1403_s12, %s1043_s17  ;;  %p1048_p12 = scmp.lt.s32.totalorder %s1403_s12, %s1478_s7 }
 0x136   : > { %p1049_p13 = scmp.lt.s32.totalorder %s1047_s30, %s1043_s17 }
 0x137   : > { %p1045_p10 = pnand %p1044_p9, %p1195_p4 }
 0x138   : > { %p1050_p0 = por %p1049_p13, %p1048_p12 }
 0x139   : > { %p1046_p11 = pneg %p1045_p10 }
 0x13b   : > { %p1051_p1 = pnand %p1050_p0, %p1046_p11 }
 0x13d   : > { %1054 = shalt.err (!%p1051_p1)
}
 0x13e   : > { %942 = dma.vmem_to_hbm [thread:$0]  (%p1195_p4), %s1405_s19, 128, %s1403_s12, %s639_s0  }
 0x13f PF: > { %p952_p2 = scmp.ge.s32.totalorder %s1109_s29, 2  ;;  %s679_s23 = sand.u32 1, %s1089_s24  }
 0x140   : > { %s680_s20 = scalar_lea.sflag [#allocation3], %s679_s23 }
 0x141   : > { %p946_p3 = pnand %p952_p2, %p1202_p8 }
 0x143   : > { %p947_p5 = pneg %p946_p3 }
 0x145   : > { %1080 = dma.done.wait (%p947_p5), %s680_s20, 128  }
 0x146   : > { %1082 = vsyncadd (%p947_p5), %s680_s20, 4294967168  ;;  %s689_s15 = scalar_lea.sflag [#allocation5], %s679_s23 }
 0x147   : > { %1084 = dma.done.wait (%p947_p5), %s689_s15, 128  }
 0x148   : > { %1086 = vsyncadd (%p947_p5), %s689_s15, 4294967168  ;;  %s24_s29 = sadd.s32 1, %s1109_s29   ;;  %s1483_s24 = smov %s1093_s25 }
 0x149   : > { %p21_p6 = scmp.ge.s32.totalorder %s24_s29, 4   ;;  %s1484_s25 = smov %s1097_s26 }
 0x14a   : > { %s1485_s26 = smov %s1208_s14  ;;  %s1486_s27 = smov %s1105_s28 }
 0x14b   : > { %s1487_s28 = smov %s1489_s9  ;;  %23 = sbr.rel (!%p21_p6) target bundleno = 8 (0x8), region = 99 }
 0x150   :  { %694 = vsyncpa [#allocation3], 1 }
 0x151   :  { %696 = vsyncpa [#allocation3 + $0x1], 1 }
 0x152   :  { %697 = vsyncpa [#allocation5], 1 }
 0x153   :  { %699 = vsyncpa [#allocation5 + $0x1], 1 }

</bundles_post_ra>
